<compile_context>
chip_gen: v7x
topology: tpu7x:2x2x1
jax: 0.10.0
libtpu: 0.0.40
codegen_flags: <defaults>
</compile_context>

<pallas_src>
import jax
import jax.numpy as jnp
from jax.experimental import pallas as pl
from jax.experimental.pallas import tpu as pltpu


def channel_attention_kernel(x_ref, w1_ref, w2_ref, o_ref):
    # x_ref: (bb, C, HW)   w1_ref: (C, C//r) (pre-scaled by 1/HW)   w2_ref: (C//r, C)
    x = x_ref[...]                                             # native dtype tile

    # --- squeeze: raw spatial sum, accumulated in f32 (1/HW folded into w1) ---
    pooled = jnp.sum(x, axis=-1, dtype=jnp.float32)            # (bb, C)
    # TODO(synk): if a bundle dump at large HW shows the XLU/extended slot
    # saturated, switch this reduce to an MXU matmul against a ones(HW,1)/HW
    # column (the MXU is idle here).

    # --- excitation: FC (no bias) -> ReLU -> FC (no bias) -> Sigmoid, all f32 ---
    h = jnp.dot(pooled, w1_ref[...], preferred_element_type=jnp.float32)  # (bb, mid)
    h = jnp.maximum(h, 0.0)
    s = jnp.dot(h, w2_ref[...], preferred_element_type=jnp.float32)       # (bb, C)
    s = jax.nn.sigmoid(s)                                      # EUP transcendental

    # --- scale: broadcast the per-(b, c) gate across the spatial lanes ---
    # Elementwise scale in the native dtype (no full f32 copy of the tile).
    o_ref[...] = (x * s.astype(o_ref.dtype)[:, :, None])       # lane-dense store


def channel_attention(x, w1, w2, *, block_budget_bytes=8 * 1024 * 1024):
    """x: (B, C, H, W); w1: (C//r, C), w2: (C, C//r) are PyTorch Linear weights."""
    B, C, H, W = x.shape
    HW = H * W
    mid = w1.shape[0]
    itemsize = jnp.dtype(x.dtype).itemsize
    w_itemsize = jnp.dtype(w1.dtype).itemsize

    # Layout-preserving flatten of the spatial dims -> lane-dense last dim.
    x3 = x.reshape(B, C, HW)
    # Pre-transpose weights so the kernel does pure row-major `y @ W`, and fold
    # the 1/HW pooling scale into the first FC (exact: linear precedes ReLU).
    w1_t = (w1.T * (1.0 / float(HW))).astype(w1.dtype)         # (C, mid)
    w2_t = w2.T                                                # (mid, C)

    # Batch-block: group batch elements while the per-step slab stays under the
    # budget (keeps blocks v7x-64MiB-safe with in+out double buffering); at
    # small shapes this collapses to a single grid step.
    per_batch_bytes = C * HW * itemsize
    bb = int(max(1, min(B, block_budget_bytes // max(per_batch_bytes, 1))))
    grid_b = pl.cdiv(B, bb)

    # Advisory cost estimate for XLA's scheduler (tiny, memory-bound call).
    cost = pl.CostEstimate(
        flops=B * C * HW + 2 * (B * C * mid) * 2,
        transcendentals=B * C,
        bytes_accessed=2 * B * C * HW * itemsize + 2 * C * mid * w_itemsize,
    )

    # Only raise the scoped-VMEM limit if the double-buffered slabs need it.
    per_step_bytes = 2 * 2 * bb * per_batch_bytes + 2 * C * mid * w_itemsize
    compiler_kwargs = dict(dimension_semantics=("parallel",))
    if per_step_bytes > (32 << 20):
        compiler_kwargs["vmem_limit_bytes"] = int(per_step_bytes * 1.25)

    out = pl.pallas_call(
        channel_attention_kernel,
        out_shape=jax.ShapeDtypeStruct((B, C, HW), x.dtype),
        grid=(grid_b,),
        in_specs=[
            pl.BlockSpec((bb, C, HW), lambda b: (b, 0, 0)),    # per-step batch slab
            pl.BlockSpec((C, mid), lambda b: (0, 0)),          # weights stay resident
            pl.BlockSpec((mid, C), lambda b: (0, 0)),
        ],
        out_specs=pl.BlockSpec((bb, C, HW), lambda b: (b, 0, 0)),
        compiler_params=pltpu.CompilerParams(**compiler_kwargs),
        cost_estimate=cost,
    )(x3, w1_t, w2_t)

    return out.reshape(B, C, H, W)


if __name__ == "__main__":
    # Small shapes consistent with the module: reduction=16 needs C >= 16.
    B, C, H, W = 2, 64, 16, 16
    reduction = 16
    mid = C // reduction                                       # 4

    root = jax.random.PRNGKey(0)
    k_x, k_w1, k_w2 = jax.random.split(root, 3)
    x = jax.random.normal(k_x, (B, C, H, W), jnp.float32)
    w1 = 0.1 * jax.random.normal(k_w1, (mid, C), jnp.float32)  # Linear(C -> C//r).weight
    w2 = 0.1 * jax.random.normal(k_w2, (C, mid), jnp.float32)  # Linear(C//r -> C).weight

    out = channel_attention(x, w1, w2)
    out = jax.block_until_ready(out)

    # Pure-JAX reference (same math as the PyTorch module, bias=False FCs).
    pooled = jnp.mean(x, axis=(2, 3))                          # (B, C)
    gate = jax.nn.sigmoid(jnp.maximum(pooled @ w1.T, 0.0) @ w2.T)
    ref = x * gate[:, :, None, None]

    assert out.shape == (B, C, H, W) and out.dtype == jnp.float32
    assert jnp.allclose(out, ref, rtol=1e-5, atol=1e-5)
    print("KERNEL_OK")
</pallas_src>

<mosaic_0001>
module attributes {stable_mosaic.version = 11 : i64} {
  func.func @channel_attention_kernel(%arg0: i32, %arg1: memref<2x64x256xf32, #tpu.memory_space<vmem>>, %arg2: memref<64x4xf32, #tpu.memory_space<vmem>>, %arg3: memref<4x64xf32, #tpu.memory_space<vmem>>, %arg4: memref<2x64x256xf32, #tpu.memory_space<vmem>>) attributes {dimension_semantics = [#tpu.dimension_semantics<parallel>], iteration_bounds = array<i64: 1>, scalar_prefetch = 0 : i64, scratch_operands = 0 : i64, tpu.core_type = #tpu.core_type<tc>, window_params = [{transform_indices = @transform_0, window_bounds = array<i64: 2, 64, 256>}, {pipeline_mode = #tpu.pipeline_mode<synchronous>, transform_indices = @transform_1, window_bounds = array<i64: 64, 4>}, {pipeline_mode = #tpu.pipeline_mode<synchronous>, transform_indices = @transform_2, window_bounds = array<i64: 4, 64>}, {transform_indices = @transform_3, window_bounds = array<i64: 2, 64, 256>}]} {
    %c0 = arith.constant 0 : index
    %c0_0 = arith.constant 0 : index
    %c0_1 = arith.constant 0 : index
    %0 = vector.load %arg1[%c0, %c0_0, %c0_1] : memref<2x64x256xf32, #tpu.memory_space<vmem>>, vector<2x64x256xf32>
    %cst = arith.constant dense<0.000000e+00> : vector<2x64xf32>
    %1 = vector.multi_reduction <add>, %0, %cst [2] : vector<2x64x256xf32> to vector<2x64xf32>
    %c0_2 = arith.constant 0 : index
    %c0_3 = arith.constant 0 : index
    %2 = vector.load %arg2[%c0_2, %c0_3] : memref<64x4xf32, #tpu.memory_space<vmem>>, vector<64x4xf32>
    %cst_4 = arith.constant dense<0.000000e+00> : vector<2x4xf32>
    %3 = tpu.matmul %1, %2, %cst_4 {dimension_numbers = #tpu.dot_dimension_numbers<[1], [0], [0], [1], [0, 0, 1, 1], [], []>} : vector<2x64xf32>, vector<64x4xf32>, vector<2x4xf32> -> vector<2x4xf32>
    %cst_5 = arith.constant 0.000000e+00 : f32
    %4 = vector.broadcast %cst_5 : f32 to vector<2x4xf32>
    %5 = arith.maximumf %3, %4 : vector<2x4xf32>
    %c0_6 = arith.constant 0 : index
    %c0_7 = arith.constant 0 : index
    %6 = vector.load %arg3[%c0_6, %c0_7] : memref<4x64xf32, #tpu.memory_space<vmem>>, vector<4x64xf32>
    %cst_8 = arith.constant dense<0.000000e+00> : vector<2x64xf32>
    %7 = tpu.matmul %5, %6, %cst_8 {dimension_numbers = #tpu.dot_dimension_numbers<[1], [0], [0], [1], [0, 0, 1, 1], [], []>} : vector<2x4xf32>, vector<4x64xf32>, vector<2x64xf32> -> vector<2x64xf32>
    %8 = arith.negf %7 : vector<2x64xf32>
    %9 = math.exp %8 : vector<2x64xf32>
    %cst_9 = arith.constant 1.000000e+00 : f32
    %10 = vector.broadcast %cst_9 : f32 to vector<2x64xf32>
    %11 = arith.addf %10, %9 : vector<2x64xf32>
    %12 = arith.divf %10, %11 : vector<2x64xf32>
    %13 = vector.shape_cast %12 : vector<2x64xf32> to vector<2x64x1xf32>
    %14 = vector.broadcast %13 : vector<2x64x1xf32> to vector<2x64x256xf32>
    %15 = arith.mulf %0, %14 : vector<2x64x256xf32>
    %c0_10 = arith.constant 0 : index
    %c0_11 = arith.constant 0 : index
    %c0_12 = arith.constant 0 : index
    %16 = vector.load %arg4[%c0_10, %c0_11, %c0_12] : memref<2x64x256xf32, #tpu.memory_space<vmem>>, vector<2x64x256xf32>
    tpu.vector_store %arg4[%c0_10, %c0_11, %c0_12], %15 {strides = array<i32>} : memref<2x64x256xf32, #tpu.memory_space<vmem>>, vector<2x64x256xf32>,
    return
  }
  func.func @transform_0(%arg0: i32) -> (i32, i32, i32) {
    %c0_i32 = arith.constant 0 : i32
    %c0_i32_0 = arith.constant 0 : i32
    %c0_i32_1 = arith.constant 0 : i32
    return %arg0, %c0_i32, %c0_i32_0 : i32, i32, i32
  }
  func.func @transform_1(%arg0: i32) -> (i32, i32) {
    %c0_i32 = arith.constant 0 : i32
    %c0_i32_0 = arith.constant 0 : i32
    %c0_i32_1 = arith.constant 0 : i32
    return %c0_i32, %c0_i32_0 : i32, i32
  }
  func.func @transform_2(%arg0: i32) -> (i32, i32) {
    %c0_i32 = arith.constant 0 : i32
    %c0_i32_0 = arith.constant 0 : i32
    %c0_i32_1 = arith.constant 0 : i32
    return %c0_i32, %c0_i32_0 : i32, i32
  }
  func.func @transform_3(%arg0: i32) -> (i32, i32, i32) {
    %c0_i32 = arith.constant 0 : i32
    %c0_i32_0 = arith.constant 0 : i32
    %c0_i32_1 = arith.constant 0 : i32
    return %arg0, %c0_i32, %c0_i32_0 : i32, i32, i32
  }
}

</mosaic_0001>

<bundles_post_ra>
// kernel: tpu_custom_call.1
= control target key start
LH: loop header
LB: loop body
LE: loop exit
PB: predicated region body
PF: predicated region fallthrough
CT: control target
= control target key end

     0   :  { %8 = vsyncpa [#allocation3], 0  ;;  %s883_s0 = inlined_call_operand.hbm [shape: f32[2,64,256], index: 0, kind: input, shape index: {}]   ;;  %s884_s1 = inlined_call_operand.vmem [shape: f32[64,4], index: 1, kind: input, shape index: {}]   ;;  %s885_s2 = inlined_call_operand.vmem [shape: f32[4,64], index: 2, kind: input, shape index: {}]   ;;  %s886_s3 = inlined_call_operand.hbm [shape: f32[2,64,256], index: 3, kind: output, shape index: {}]  }
   0x1   :  { %9 = vsyncpa [#allocation4], 0  ;;  %s649_s12 = smov [#allocation2]   ;;  %s601_s16 = scalar_lea.hbm %s883_s0, 4096 }
   0x2   :  { %s15_s13 = sshll.u32 %s649_s12, 4  ;;  %p602_p0 = scmp.ne.s32.totalorder %s883_s0, %s601_s16  ;;  %s16_s13 = int_to_ptr.vmem [resolvable:$true] %s15_s13 }
   0x3   :  { %p605_p1 = scmp.lt.u32.totalorder %s601_s16, %s883_s0 }
   0x5   :  { %p607_p2 = pnand %p605_p1, %p602_p0 }
   0x7   :  { %610 = shalt.err (!%p607_p2)
}
   0x8   :  { %s611_s21 = scalar_lea.vmem %s16_s13, 4096  ;;  %p616_p4 = scmp.lt.s32.totalorder %s16_s13, %s16_s13 }
   0x9   :  { %p612_p3 = scmp.ne.s32.totalorder %s16_s13, %s611_s21  ;;  %p617_p5 = scmp.lt.s32.totalorder %s611_s21, %s611_s21 }
   0xb   :  { %p618_p6 = por %p617_p5, %p616_p4 }
   0xd   :  { %p619_p7 = pnand %p618_p6, %p612_p3 }
   0xf   :  { %622 = shalt.err (!%p619_p7)
}
  0x10   :  { %s650_s22 = smov 256   ;;  %s651_s23 = smov 16  }
  0x11   :  { %21 = dma.hbm_to_vmem [thread:$0]  %s883_s0, 4096, %s16_s13, [#allocation3], %s650_s22, %s650_s22, %s651_s23  }
  0x12   :  { %645 = dma.done.wait [#allocation3], 4096  }
  0x13   :  { %646 = vsyncadd [#allocation3], 4294963200  ;;  %v691_v0 = vld [vmem:[#allocation2 + $0x80] sm:$0xff]  ;;  %v693_v1 = vld [vmem:[#allocation2 + $0x88] sm:$0xff]  ;;  %v652_v51 = vmov 0.0|0.0   ;;  %vm653_vm0 = vmmov 0  }
  0x14   :  { %v695_v2 = vld [vmem:[#allocation2] sm:$0xff]  ;;  %v85_v3 = vadd.f32 %v693_v1, %v691_v0  ;;  %v699_v4 = vld [vmem:[#allocation2 + $0x8] sm:$0xff]  ;;  %v701_v5 = vld [vmem:[#allocation2 + $0x90] sm:$0xff]  ;;  %578 = vmatprep.subr.bf16.mxu0 %v652_v51  ;;  %v654_v61 = vmov 0.0   ;;  %vm144_vm1 = vcmask 130112   ;;  %vm151_vm2 = vcmask 195712  }
  0x15   :  { %v703_v6 = vld [vmem:[#allocation2 + $0x98] sm:$0xff]  ;;  %v61_v7 = vadd.f32 %v699_v4, %v695_v2  ;;  %v707_v8 = vld [vmem:[#allocation2 + $0x10] sm:$0xff]  ;;  %v715_v12 = vld [vmem:[#allocation2 + $0xa0] sm:$0xff]  ;;  %570 = vmatprep.mubr.msk.f32.mxu0 %vm653_vm0, %v654_v61  ;;  %573 = vmatprep.subr.mxu1 %v654_v61  ;;  %vm158_vm3 = vcmask 261312   ;;  %vm165_vm4 = vcmask 326912   ;;  %vm172_vm5 = vcmask 392512  }
  0x16   :  { %v709_v9 = vld [vmem:[#allocation2 + $0x18] sm:$0xff]  ;;  %86 = vadd.xlane.f32.xlu1 %v85_v3  ;;  %v88_v10 = vadd.f32 %v703_v6, %v701_v5  ;;  %v717_v13 = vld [vmem:[#allocation2 + $0xa8] sm:$0xff]  ;;  %v719_v14 = vld [vmem:[#allocation2 + $0x20] sm:$0xff]  ;;  %575 = vmatprep.mubr.msk.f32.mxu1 %vm653_vm0, %v654_v61  ;;  %vm179_vm6 = vcmask 458112   ;;  %vm186_vm7 = vcmask 523712   ;;  %vm227_vm8 = vcmask 1041409  }
  0x17   :  { %62 = vadd.xlane.f32.xlu0 %v61_v7  ;;  %v64_v11 = vadd.f32 %v709_v9, %v707_v8  ;;  %v721_v15 = vld [vmem:[#allocation2 + $0x28] sm:$0xff]  ;;  %v91_v16 = vadd.f32 %v717_v13, %v715_v12  ;;  %v727_v18 = vld [vmem:[#allocation2 + $0xb0] sm:$0xff]  ;;  %v729_v19 = vld [vmem:[#allocation2 + $0xb8] sm:$0xff]  ;;  %vm229_vm9 = vcmask 523264   ;;  %vm308_vm10 = vcmask 1043456  }
  0x18   :  { %v67_v17 = vadd.f32 %v721_v15, %v719_v14  ;;  %v731_v20 = vld [vmem:[#allocation2 + $0x30] sm:$0xff]  ;;  %v733_v21 = vld [vmem:[#allocation2 + $0x38] sm:$0xff]  ;;  %v94_v22 = vadd.f32 %v729_v19, %v727_v18  ;;  %v739_v24 = vld [vmem:[#allocation2 + $0xc0] sm:$0xff]  ;;  %vm304_vm11 = vcmask 31744  }
  0x19   :  { %v70_v23 = vadd.f32 %v733_v21, %v731_v20  ;;  %v741_v25 = vld [vmem:[#allocation2 + $0xc8] sm:$0xff]  ;;  %v743_v26 = vld [vmem:[#allocation2 + $0x40] sm:$0xff]  ;;  %v751_v30 = vld [vmem:[#allocation2 + $0xd0] sm:$0xff] }
  0x1a   :  { %89 = vadd.xlane.f32.xlu1 %v88_v10  ;;  %v745_v27 = vld [vmem:[#allocation2 + $0x48] sm:$0xff]  ;;  %v97_v28 = vadd.f32 %v741_v25, %v739_v24  ;;  %891 = vst [vmem:[#allocation8_spill] sm:$0xff] %v751_v30  ;;  %v753_v31 = vld [vmem:[#allocation2 + $0xd8] sm:$0xff]  ;;  %v755_v32 = vld [vmem:[#allocation2 + $0x50] sm:$0xff]  ;;  %v133_v10 = vlaneseq }
  0x1b   :  { %65 = vadd.xlane.f32.xlu0 %v64_v11  ;;  %v73_v29 = vadd.f32 %v745_v27, %v743_v26  ;;  %892 = vst [vmem:[#allocation9_spill] sm:$0xff] %v753_v31  ;;  %v757_v33 = vld [vmem:[#allocation2 + $0x58] sm:$0xff]  ;;  %v100_v34 = vadd.f32 %v753_v31, %v751_v30  ;;  %v763_v36 = vld [vmem:[#allocation2 + $0xe0] sm:$0xff]  ;;  %v765_v37 = vld [vmem:[#allocation2 + $0xe8] sm:$0xff] }
  0x1c   :  { %v76_v35 = vadd.f32 %v757_v33, %v755_v32  ;;  %v767_v38 = vld [vmem:[#allocation2 + $0x60] sm:$0xff]  ;;  %v769_v39 = vld [vmem:[#allocation2 + $0x68] sm:$0xff]  ;;  %v103_v40 = vadd.f32 %v765_v37, %v763_v36  ;;  %v775_v42 = vld [vmem:[#allocation2 + $0xf0] sm:$0xff] }
  0x1d   :  { %v79_v41 = vadd.f32 %v769_v39, %v767_v38  ;;  %893 = vst [vmem:[#allocation10_spill] sm:$0xff] %v775_v42  ;;  %v777_v43 = vld [vmem:[#allocation2 + $0xf8] sm:$0xff]  ;;  %v779_v44 = vld [vmem:[#allocation2 + $0x70] sm:$0xff]  ;;  %v109_v48 = vld [vmem:[%s884_s1] sm:$0xff] }
  0x1e   :  { %92 = vadd.xlane.f32.xlu1 %v91_v16  ;;  %894 = vst [vmem:[#allocation11_spill] sm:$0xff] %v777_v43  ;;  %v781_v45 = vld [vmem:[#allocation2 + $0x78] sm:$0xff]  ;;  %v106_v46 = vadd.f32 %v777_v43, %v775_v42  ;;  %v110_v49 = vld [vmem:[%s884_s1 + $0x8] sm:$0xff]  ;;  %v111_v52 = vld [vmem:[%s884_s1 + $0x10] sm:$0xff] }
  0x1f   :  { %68 = vadd.xlane.f32.xlu0 %v67_v17  ;;  %v82_v47 = vadd.f32 %v781_v45, %v779_v44  ;;  %v579_v50 = vpack.c.bf16 %v110_v49, %v109_v48  ;;  %v112_v53 = vld [vmem:[%s884_s1 + $0x18] sm:$0xff]  ;;  %v113_v55 = vld [vmem:[%s884_s1 + $0x20] sm:$0xff]  ;;  %v114_v56 = vld [vmem:[%s884_s1 + $0x28] sm:$0xff]  ;;  %v134_v17 = vand.u32 127, %v133_v10 }
  0x20   :  { %v582_v54 = vpack.c.bf16 %v112_v53, %v111_v52  ;;  %v585_v57 = vpack.c.bf16 %v114_v56, %v113_v55  ;;  %v115_v58 = vld [vmem:[%s884_s1 + $0x30] sm:$0xff]  ;;  %v116_v59 = vld [vmem:[%s884_s1 + $0x38] sm:$0xff] }
  0x21   :  { %580 = vmatpush3.bf16.msra.mxu0 %v579_v50  ;;  %v588_v60 = vpack.c.bf16 %v116_v59, %v115_v58  ;;  %v167_v48 = vadd.s32 4294967256, %v134_v17  ;;  %v174_v50 = vadd.s32 4294967248, %v134_v17  ;;  %v181_v58 = vadd.s32 4294967240, %v134_v17 }
  0x22   :  { %95 = vadd.xlane.f32.xlu1 %v94_v22  ;;  %581 = vmatprep.subr.bf16.mxu0 %v652_v51 }
  0x23   :  { %71 = vadd.xlane.f32.xlu0 %v70_v23  ;;  %v139_v23 = vadd.s32 4294967288, %v134_v17 }
  0x25   :  { %583 = vmatpush3.bf16.msra.mxu0 %v582_v54 }
  0x26   :  { %98 = vadd.xlane.f32.xlu1 %v97_v28  ;;  %584 = vmatprep.subr.bf16.mxu0 %v652_v51 }
  0x27   :  { %74 = vadd.xlane.f32.xlu0 %v73_v29  ;;  %v146_v29 = vadd.s32 4294967280, %v134_v17 }
  0x29   :  { %586 = vmatpush3.bf16.msra.mxu0 %v585_v57 }
  0x2a   :  { %101 = vadd.xlane.f32.xlu1 %v100_v34  ;;  %587 = vmatprep.subr.bf16.mxu0 %v652_v51  ;;  %v811_v34 = vshrl.u32 %v133_v10, 7 }
  0x2b   :  { %77 = vadd.xlane.f32.xlu0 %v76_v35  ;;  %v153_v35 = vadd.s32 4294967272, %v134_v17 }
  0x2c   :  { %v149_v49 = vsub.s32 %v146_v29, %v811_v34  ;;  %v137_v51 = vsub.s32 %v134_v17, %v811_v34  ;;  %v170_v56 = vsub.s32 %v167_v48, %v811_v34  ;;  %v177_v61 = vsub.s32 %v174_v50, %v811_v34 }
  0x2d   :  { %589 = vmatpush3.bf16.msra.mxu0 %v588_v60  ;;  %v156_v52 = vsub.s32 %v153_v35, %v811_v34 }
  0x2e   :  { %104 = vadd.xlane.f32.xlu1 %v103_v40  ;;  %v160_v40 = vadd.s32 4294967264, %v134_v17 }
  0x2f   :  { %80 = vadd.xlane.f32.xlu0 %v79_v41 }
  0x30   :  { %v163_v53 = vsub.s32 %v160_v40, %v811_v34 }
  0x32   :  { %107 = vadd.xlane.f32.xlu1 %v106_v46  ;;  %v142_v46 = vsub.s32 %v139_v23, %v811_v34 }
  0x33   :  { %83 = vadd.xlane.f32.xlu0 %v82_v47 }
  0xa3   :  { %v87_v62 = vpop.xlane.xlu1 %86 }
  0xa4   :  { %v63_v63 = vpop.xlane.xlu0 %62  ;;  %v191_v10 = vrot.slane %v87_v62, %v137_v51 }
  0xa5   :  { %v138_v35 = vrot.slane %v63_v63, %v137_v51 }
  0xa7   :  { %v90_v3 = vpop.xlane.xlu1 %89 }
  0xa8   :  { %v66_v7 = vpop.xlane.xlu0 %65  ;;  %v195_v55 = vrot.slane %v90_v3, %v142_v46 }
  0xa9   :  { %v143_v59 = vrot.slane %v66_v7, %v142_v46  ;;  %v184_v7 = vsub.s32 %v181_v58, %v811_v34 }
  0xaa   :  { %v196_v3 = vsel %vm144_vm1, %v195_v55, %v191_v10 }
  0xab   :  { %v93_v11 = vpop.xlane.xlu1 %92 }
  0xac   :  { %v69_v16 = vpop.xlane.xlu0 %68  ;;  %v200_v60 = vrot.slane %v93_v11, %v149_v49  ;;  %v145_v11 = vsel %vm144_vm1, %v143_v59, %v138_v35  ;;  %v390_v35 = vsub.s32 0, %v811_v34 }
  0xad   :  { %v150_v23 = vrot.slane %v69_v16, %v149_v49 }
  0xae   :  { %v201_v17 = vsel %vm151_vm2, %v200_v60, %v196_v3 }
  0xaf   :  { %v96_v22 = vpop.xlane.xlu1 %95 }
  0xb0   :  { %v72_v28 = vpop.xlane.xlu0 %71  ;;  %v205_v29 = vrot.slane %v96_v22, %v156_v52  ;;  %v152_v22 = vsel %vm151_vm2, %v150_v23, %v145_v11 }
  0xb1   :  { %v157_v43 = vrot.slane %v72_v28, %v156_v52 }
  0xb2   :  { %v206_v63 = vsel %vm158_vm3, %v205_v29, %v201_v17 }
  0xb3   :  { %v99_v41 = vpop.xlane.xlu1 %98 }
  0xb4   :  { %v75_v47 = vpop.xlane.xlu0 %74  ;;  %v210_v42 = vrot.slane %v99_v41, %v163_v53  ;;  %v159_v41 = vsel %vm158_vm3, %v157_v43, %v152_v22 }
  0xb5   :  { %v164_v31 = vrot.slane %v75_v47, %v163_v53 }
  0xb6   :  { %v211_v46 = vsel %vm165_vm4, %v210_v42, %v206_v63  ;;  %v303_v42 = vld [vmem:[%s885_s2] sm:$0xf]  ;;  %s655_s2 = smov [#allocation5]  }
  0xb7   :  { %v102_v54 = vpop.xlane.xlu1 %101  ;;  %v166_v49 = vsel %vm165_vm4, %v164_v31, %v159_v41  ;;  %574 = vmatpush3.msk.msra.mxu1 %vm308_vm10, %v303_v42  ;;  %s527_s15 = sshll.u32 %s655_s2, 4  ;;  %s528_s15 = int_to_ptr.vmem [resolvable:$true] %s527_s15 }
  0xb8   :  { %v78_v57 = vpop.xlane.xlu0 %77  ;;  %v215_v48 = vrot.slane %v102_v54, %v170_v56  ;;  %s623_s16 = scalar_lea.vmem %s528_s15, 4096  ;;  %p628_p9 = scmp.lt.s32.totalorder %s528_s15, %s528_s15 }
  0xb9   :  { %v171_v62 = vrot.slane %v78_v57, %v170_v56  ;;  %p624_p8 = scmp.ne.s32.totalorder %s528_s15, %s623_s16  ;;  %p629_p10 = scmp.lt.s32.totalorder %s623_s16, %s623_s16 }
  0xba   :  { %v216_v50 = vsel %vm172_vm5, %v215_v48, %v211_v46  ;;  %v425_v48 = vsub.s32 1, %v811_v34 }
  0xbb   :  { %v105_v40 = vpop.xlane.xlu1 %104  ;;  %v173_v53 = vsel %vm172_vm5, %v171_v62, %v166_v49  ;;  %p630_p11 = por %p629_p10, %p628_p9 }
  0xbc   :  { %v81_v30 = vpop.xlane.xlu0 %80  ;;  %v220_v16 = vrot.slane %v105_v40, %v177_v61 }
  0xbd   :  { %v178_v28 = vrot.slane %v81_v30, %v177_v61  ;;  %p631_p12 = pnand %p630_p11, %p624_p8 }
  0xbe   :  { %v221_v54 = vsel %vm179_vm6, %v220_v16, %v216_v50 }
  0xbf   :  { %v108_v47 = vpop.xlane.xlu1 %107  ;;  %v180_v56 = vsel %vm179_vm6, %v178_v28, %v173_v53 }
  0xc0   :  { %v225_v51 = vrot.slane %v108_v47, %v184_v7  ;;  %v84_v52 = vpop.xlane.xlu0 %83 }
  0xc1   :  { %v185_v55 = vrot.slane %v84_v52, %v184_v7 }
  0xc2   :  { %v226_v57 = vsel %vm186_vm7, %v225_v51, %v221_v54 }
  0xc3   :  { %v187_v30 = vsel %vm186_vm7, %v185_v55, %v180_v56 }
  0xc4   :  { %v228_v43 = vsel %vm227_vm8, %v226_v57, %v187_v30 }
  0xc5   :  { %571 = vmatmul.mubr.msk.f32.vlgmr.msra.gmra.mrb[0].mxu0 %vm229_vm9, %v228_v43  ;;  %v896_v43 = vld [vmem:[#allocation9_spill] sm:$0xff] }
 0x198   :  { %v298_v31 = vpop.f32.mrb[0].mxu0 }
 0x199   :  { %v302_v58 = vmax.f32 %v298_v31, 0.0  ;;  %v572_v59 = vpop.f32.mrb[1].mxu0  ;;  %v897_v31 = vld [vmem:[#allocation10_spill] sm:$0xff] }
 0x19b   :  { %576 = vmatmul.mubr.msk.f32.vlgmr.msra.gmra.mrb[0].mxu1 %vm304_vm11, %v302_v58  ;;  %v898_v58 = vld [vmem:[#allocation11_spill] sm:$0xff] }
 0x26e   :  { %v378_v60 = vpop.f32.mrb[0].mxu1 }
 0x26f   :  { %v542_v61 = vmul.f32 -1.442695, %v378_v60  ;;  %v577_v10 = vpop.f32.mrb[1].mxu1 }
 0x271   :  { %597 = vpow2.f32 %v542_v61 }
 0x27b   :  { %v598_v23 = vpop.eup %597 }
 0x27c   :  { %v385_v29 = vadd.f32 1.0, %v598_v23 }
 0x27e   :  { %599 = vrcp.f32 %v385_v29 }
 0x288   :  { %v600_v40 = vpop.eup %599 }
 0x289   :  { %v391_v3 = vrot.slane %v600_v40, %v390_v35  ;;  %v426_v7 = vrot.slane %v600_v40, %v425_v48 }
 0x28b   :  { %397 = vbcast.lane.b32.xlu1 %v391_v3, 264  ;;  %393 = vbcast.lane.b32.xlu0 %v391_v3, 256 }
 0x28f   :  { %401 = vbcast.lane.b32.xlu1 %v391_v3, 272  ;;  %409 = vbcast.lane.b32.xlu0 %v391_v3, 288 }
 0x293   :  { %405 = vbcast.lane.b32.xlu1 %v391_v3, 280  ;;  %417 = vbcast.lane.b32.xlu0 %v391_v3, 304 }
 0x297   :  { %413 = vbcast.lane.b32.xlu1 %v391_v3, 296  ;;  %428 = vbcast.lane.b32.xlu0 %v426_v7, 256 }
 0x29b   :  { %421 = vbcast.lane.b32.xlu1 %v391_v3, 312  ;;  %436 = vbcast.lane.b32.xlu0 %v426_v7, 272 }
 0x29f   :  { %432 = vbcast.lane.b32.xlu1 %v426_v7, 264  ;;  %444 = vbcast.lane.b32.xlu0 %v426_v7, 288 }
 0x2a3   :  { %440 = vbcast.lane.b32.xlu1 %v426_v7, 280  ;;  %452 = vbcast.lane.b32.xlu0 %v426_v7, 304 }
 0x2a7   :  { %448 = vbcast.lane.b32.xlu1 %v426_v7, 296 }
 0x2ab   :  { %456 = vbcast.lane.b32.xlu1 %v426_v7, 312 }
 0x2fd   :  { %v398_v11 = vpop.permute.xlu1 %397  ;;  %v394_v17 = vpop.permute.xlu0 %393 }
 0x2fe   :  { %v460_v62 = vmul.f32 %v398_v11, %v707_v8  ;;  %v461_v16 = vmul.f32 %v398_v11, %v709_v9  ;;  %v458_v34 = vmul.f32 %v394_v17, %v695_v2  ;;  %v459_v22 = vmul.f32 %v394_v17, %v699_v4 }
 0x300   :  { %492 = vst [vmem:[#allocation5 + $0x10] sm:$0xff] %v460_v62  ;;  %493 = vst [vmem:[#allocation5 + $0x18] sm:$0xff] %v461_v16 }
 0x301   :  { %490 = vst [vmem:[#allocation5] sm:$0xff] %v458_v34  ;;  %491 = vst [vmem:[#allocation5 + $0x8] sm:$0xff] %v459_v22  ;;  %v402_v63 = vpop.permute.xlu1 %401  ;;  %v410_v28 = vpop.permute.xlu0 %409 }
 0x302   :  { %v462_v41 = vmul.f32 %v402_v63, %v719_v14  ;;  %v463_v46 = vmul.f32 %v402_v63, %v721_v15  ;;  %v466_v47 = vmul.f32 %v410_v28, %v743_v26  ;;  %v467_v8 = vmul.f32 %v410_v28, %v745_v27 }
 0x304   :  { %494 = vst [vmem:[#allocation5 + $0x20] sm:$0xff] %v462_v41  ;;  %495 = vst [vmem:[#allocation5 + $0x28] sm:$0xff] %v463_v46 }
 0x305   :  { %498 = vst [vmem:[#allocation5 + $0x40] sm:$0xff] %v466_v47  ;;  %499 = vst [vmem:[#allocation5 + $0x48] sm:$0xff] %v467_v8  ;;  %v406_v2 = vpop.permute.xlu1 %405  ;;  %v418_v4 = vpop.permute.xlu0 %417 }
 0x306   :  { %v464_v9 = vmul.f32 %v406_v2, %v731_v20  ;;  %v465_v49 = vmul.f32 %v406_v2, %v733_v21  ;;  %v470_v50 = vmul.f32 %v418_v4, %v767_v38  ;;  %v471_v14 = vmul.f32 %v418_v4, %v769_v39 }
 0x308   :  { %496 = vst [vmem:[#allocation5 + $0x30] sm:$0xff] %v464_v9  ;;  %497 = vst [vmem:[#allocation5 + $0x38] sm:$0xff] %v465_v49 }
 0x309   :  { %502 = vst [vmem:[#allocation5 + $0x60] sm:$0xff] %v470_v50  ;;  %503 = vst [vmem:[#allocation5 + $0x68] sm:$0xff] %v471_v14  ;;  %v414_v15 = vpop.permute.xlu1 %413  ;;  %v429_v26 = vpop.permute.xlu0 %428 }
 0x30a   :  { %v468_v27 = vmul.f32 %v414_v15, %v755_v32  ;;  %v469_v51 = vmul.f32 %v414_v15, %v757_v33  ;;  %v474_v52 = vmul.f32 %v429_v26, %v691_v0  ;;  %v475_v20 = vmul.f32 %v429_v26, %v693_v1 }
 0x30c   :  { %500 = vst [vmem:[#allocation5 + $0x50] sm:$0xff] %v468_v27  ;;  %501 = vst [vmem:[#allocation5 + $0x58] sm:$0xff] %v469_v51 }
 0x30d   :  { %506 = vst [vmem:[#allocation5 + $0x80] sm:$0xff] %v474_v52  ;;  %507 = vst [vmem:[#allocation5 + $0x88] sm:$0xff] %v475_v20  ;;  %v422_v21 = vpop.permute.xlu1 %421  ;;  %v437_v38 = vpop.permute.xlu0 %436 }
 0x30e   :  { %v472_v39 = vmul.f32 %v422_v21, %v779_v44  ;;  %v473_v53 = vmul.f32 %v422_v21, %v781_v45  ;;  %v478_v54 = vmul.f32 %v437_v38, %v715_v12  ;;  %v479_v32 = vmul.f32 %v437_v38, %v717_v13 }
 0x310   :  { %504 = vst [vmem:[#allocation5 + $0x70] sm:$0xff] %v472_v39  ;;  %505 = vst [vmem:[#allocation5 + $0x78] sm:$0xff] %v473_v53 }
 0x311   :  { %510 = vst [vmem:[#allocation5 + $0xa0] sm:$0xff] %v478_v54  ;;  %511 = vst [vmem:[#allocation5 + $0xa8] sm:$0xff] %v479_v32  ;;  %v433_v0 = vpop.permute.xlu1 %432  ;;  %v445_v1 = vpop.permute.xlu0 %444 }
 0x312   :  { %v476_v33 = vmul.f32 %v433_v0, %v701_v5  ;;  %v477_v55 = vmul.f32 %v433_v0, %v703_v6  ;;  %v482_v56 = vmul.f32 %v445_v1, %v739_v24  ;;  %v483_v44 = vmul.f32 %v445_v1, %v741_v25  ;;  %v895_v24 = vld [vmem:[#allocation8_spill] sm:$0xff] }
 0x314   :  { %508 = vst [vmem:[#allocation5 + $0x90] sm:$0xff] %v476_v33  ;;  %509 = vst [vmem:[#allocation5 + $0x98] sm:$0xff] %v477_v55 }
 0x315   :  { %514 = vst [vmem:[#allocation5 + $0xc0] sm:$0xff] %v482_v56  ;;  %515 = vst [vmem:[#allocation5 + $0xc8] sm:$0xff] %v483_v44  ;;  %v441_v12 = vpop.permute.xlu1 %440  ;;  %v453_v13 = vpop.permute.xlu0 %452 }
 0x316   :  { %v480_v45 = vmul.f32 %v441_v12, %v727_v18  ;;  %v481_v57 = vmul.f32 %v441_v12, %v729_v19  ;;  %v486_v30 = vmul.f32 %v453_v13, %v763_v36  ;;  %v487_v5 = vmul.f32 %v453_v13, %v765_v37 }
 0x318   :  { %512 = vst [vmem:[#allocation5 + $0xb0] sm:$0xff] %v480_v45  ;;  %513 = vst [vmem:[#allocation5 + $0xb8] sm:$0xff] %v481_v57 }
 0x319   :  { %518 = vst [vmem:[#allocation5 + $0xe0] sm:$0xff] %v486_v30  ;;  %519 = vst [vmem:[#allocation5 + $0xe8] sm:$0xff] %v487_v5  ;;  %v449_v6 = vpop.permute.xlu1 %448 }
 0x31a   :  { %v484_v25 = vmul.f32 %v449_v6, %v895_v24  ;;  %v485_v42 = vmul.f32 %v449_v6, %v896_v43 }
 0x31c   :  { %516 = vst [vmem:[#allocation5 + $0xd0] sm:$0xff] %v484_v25  ;;  %517 = vst [vmem:[#allocation5 + $0xd8] sm:$0xff] %v485_v42 }
 0x31d   :  { %v457_v18 = vpop.permute.xlu1 %456 }
 0x31e   :  { %v488_v19 = vmul.f32 %v457_v18, %v897_v31  ;;  %v489_v36 = vmul.f32 %v457_v18, %v898_v58 }
 0x320   :  { %520 = vst [vmem:[#allocation5 + $0xf0] sm:$0xff] %v488_v19  ;;  %521 = vst [vmem:[#allocation5 + $0xf8] sm:$0xff] %v489_v36 }
 0x321   :  { %634 = shalt.err (!%p631_p12)
}
 0x322   :  { %s635_s19 = scalar_lea.hbm %s886_s3, 4096 }
 0x323   :  { %p636_p13 = scmp.ne.s32.totalorder %s886_s3, %s635_s19  ;;  %p639_p0 = scmp.lt.u32.totalorder %s635_s19, %s886_s3 }
 0x325   :  { %p641_p1 = pnand %p639_p0, %p636_p13 }
 0x327   :  { %644 = shalt.err (!%p641_p1)
}
 0x328   :  { %533 = dma.vmem_to_hbm [thread:$0]  %s528_s15, 4096, %s886_s3, [#allocation4], %s650_s22, %s650_s22, %s651_s23  }
 0x329   :  { %647 = dma.done.wait [#allocation4], 4096  }
 0x32a   :  { %648 = vsyncadd [#allocation4], 4294963200 }
 0x32b   :  { %537 = vsyncpa [#allocation3], 1 }
 0x32c   :  { %538 = vsyncpa [#allocation4], 1 }

</bundles_post_ra>
